<compile_context>
chip_gen: v7x
topology: tpu7x:2x2x1
jax: 0.10.0
libtpu: 0.0.40
codegen_flags: <defaults>
</compile_context>

<pallas_src>
import jax
import jax.numpy as jnp
from jax.experimental import pallas as pl
from jax.experimental.pallas import tpu as pltpu


def _round_up(x, m):
    return ((x + m - 1) // m) * m


def link_kernel(adj_ref, w_ref, b_ref, o_ref):
    k = pl.program_id(1)
    tk = adj_ref.shape[1]

    @pl.when(k == 0)
    def _():
        o_ref[...] = jnp.zeros_like(o_ref)

    # Cast the (possibly int8/bf16) adjacency tile to f32 for an exact dot.
    a = adj_ref[...].astype(jnp.float32)

    # W^T is fully resident in VMEM; slice the K chunk for this grid step.
    start = pl.multiple_of(k * tk, tk)
    w = w_ref[pl.ds(start, tk), :]

    o_ref[...] += jnp.dot(a, w, preferred_element_type=jnp.float32)

    @pl.when(k == pl.num_programs(1) - 1)
    def _():
        o_ref[...] += b_ref[...]  # (1, C) broadcast over (tm, C)


def link_forward(adj, weight, bias, *, tm=512, tk=2048):
    """adj: (N, N) any dtype (int8/bf16/f32); weight: (C, N); bias: (C,)."""
    n_nodes = adj.shape[0]
    out_channels = weight.shape[0]

    # Clamp tile sizes for small graphs; keep sublane/lane-friendly multiples.
    tm_eff = min(tm, _round_up(n_nodes, 32))
    tk_eff = min(tk, _round_up(n_nodes, 128))
    n_pr = _round_up(n_nodes, tm_eff)   # padded rows of adj / output
    n_pc = _round_up(n_nodes, tk_eff)   # padded cols of adj / rows of W^T

    # Zero-pad adj and W^T; padded K region multiplies to zero, padded output
    # rows are sliced off below.
    adj_p = adj
    if (n_pr, n_pc) != adj.shape:
        adj_p = jnp.zeros((n_pr, n_pc), adj.dtype).at[:n_nodes, :n_nodes].set(adj)
    w_t = weight.T.astype(jnp.float32)
    if n_pc != n_nodes:
        w_t = jnp.zeros((n_pc, out_channels), jnp.float32).at[:n_nodes, :].set(w_t)
    b2 = bias.reshape(1, out_channels).astype(jnp.float32)

    # Scoped VMEM budget: double-buffered adj tile + resident W^T + out tile.
    adj_bytes = jnp.dtype(adj_p.dtype).itemsize
    vmem_bytes = (2 * tm_eff * tk_eff * adj_bytes
                  + 2 * n_pc * out_channels * 4
                  + 2 * tm_eff * out_channels * 4
                  + (4 << 20))
    vmem_limit = int(min(max(vmem_bytes, 32 << 20), 64 << 20))

    grid = (n_pr // tm_eff, n_pc // tk_eff)
    out = pl.pallas_call(
        link_kernel,
        out_shape=jax.ShapeDtypeStruct((n_pr, out_channels), jnp.float32),
        grid_spec=pltpu.PrefetchScalarGridSpec(
            num_scalar_prefetch=0,
            grid=grid,
            in_specs=[
                # adj tile, streamed over (i, k)
                pl.BlockSpec((tm_eff, tk_eff), lambda i, k: (i, k)),
                # W^T fully resident (constant block index -> DMA'd once)
                pl.BlockSpec((n_pc, out_channels), lambda i, k: (0, 0)),
                # bias
                pl.BlockSpec((1, out_channels), lambda i, k: (0, 0)),
            ],
            out_specs=pl.BlockSpec((tm_eff, out_channels), lambda i, k: (i, 0)),
        ),
        compiler_params=pltpu.CompilerParams(
            dimension_semantics=("parallel", "arbitrary"),
            vmem_limit_bytes=vmem_limit,
        ),
    )(adj_p, w_t, b2)

    out = out[:n_nodes]
    # Match PyTorch `logits.squeeze(1)`: only squeezes when out_channels == 1.
    if out_channels == 1:
        out = jnp.squeeze(out, axis=1)
    return out


if __name__ == "__main__":
    num_nodes = 256
    out_channels = 16

    key = jax.random.PRNGKey(0)
    k_adj, k_w, k_b = jax.random.split(key, 3)

    # Synthetic 0/1 adjacency matrix.  Stored as int8 for the kernel (4x less
    # HBM traffic); reference path uses the exact f32 equivalent.
    adj_f32 = (jax.random.uniform(k_adj, (num_nodes, num_nodes)) < 0.1).astype(
        jnp.float32
    )
    adj_i8 = adj_f32.astype(jnp.int8)

    # Deterministic Linear init (kaiming-uniform-style bound, like PyTorch).
    bound = 1.0 / jnp.sqrt(num_nodes)
    weight = jax.random.uniform(
        k_w, (out_channels, num_nodes), minval=-bound, maxval=bound
    ).astype(jnp.float32)
    bias = jax.random.uniform(
        k_b, (out_channels,), minval=-bound, maxval=bound
    ).astype(jnp.float32)

    logits = jax.block_until_ready(link_forward(adj_i8, weight, bias))

    # Reference check against plain JAX.
    ref = adj_f32 @ weight.T + bias
    assert logits.shape == (num_nodes, out_channels)
    assert jnp.allclose(logits, ref, atol=1e-5, rtol=1e-5)

    print("KERNEL_OK")
</pallas_src>

<mosaic_0001>
module attributes {stable_mosaic.version = 11 : i64} {
  func.func @link_kernel(%arg0: i32, %arg1: i32, %arg2: memref<256x256xi8, #tpu.memory_space<vmem>>, %arg3: memref<256x16xf32, #tpu.memory_space<vmem>>, %arg4: memref<1x16xf32, #tpu.memory_space<vmem>>, %arg5: memref<256x16xf32, #tpu.memory_space<vmem>>) attributes {dimension_semantics = [#tpu.dimension_semantics<parallel>, #tpu.dimension_semantics<arbitrary>], iteration_bounds = array<i64: 1, 1>, scalar_prefetch = 0 : i64, scratch_operands = 0 : i64, tpu.core_type = #tpu.core_type<tc>, window_params = [{transform_indices = @transform_0, window_bounds = array<i64: 256, 256>}, {pipeline_mode = #tpu.pipeline_mode<synchronous>, transform_indices = @transform_1, window_bounds = array<i64: 256, 16>}, {pipeline_mode = #tpu.pipeline_mode<synchronous>, transform_indices = @transform_2, window_bounds = array<i64: 1, 16>}, {transform_indices = @transform_3, window_bounds = array<i64: 256, 16>}]} {
    %c0_i32 = arith.constant 0 : i32
    %0 = arith.cmpi eq, %arg1, %c0_i32 : i32
    %1 = arith.extui %0 : i1 to i32
    %c0_i32_0 = arith.constant 0 : i32
    %2 = arith.cmpi ne, %1, %c0_i32_0 : i32
    scf.if %2 {
      %cst_9 = arith.constant 0.000000e+00 : f32
      %16 = vector.broadcast %cst_9 : f32 to vector<256x16xf32>
      %c0_10 = arith.constant 0 : index
      %c0_11 = arith.constant 0 : index
      %17 = vector.load %arg5[%c0_10, %c0_11] : memref<256x16xf32, #tpu.memory_space<vmem>>, vector<256x16xf32>
      tpu.vector_store %arg5[%c0_10, %c0_11], %16 {strides = array<i32>} : memref<256x16xf32, #tpu.memory_space<vmem>>, vector<256x16xf32>,
    } else {
    }
    %c0 = arith.constant 0 : index
    %c0_1 = arith.constant 0 : index
    %3 = vector.load %arg2[%c0, %c0_1] : memref<256x256xi8, #tpu.memory_space<vmem>>, vector<256x256xi8>
    %4 = arith.sitofp %3 : vector<256x256xi8> to vector<256x256xf32>
    %c256_i32 = arith.constant 256 : i32
    %5 = arith.muli %arg1, %c256_i32 : i32
    %6 = tpu.assume_multiple %5, 256 : i32
    %7 = arith.index_cast %6 : i32 to index
    %c0_2 = arith.constant 0 : index
    %8 = vector.load %arg3[%7, %c0_2] : memref<256x16xf32, #tpu.memory_space<vmem>>, vector<256x16xf32>
    %c0_3 = arith.constant 0 : index
    %c0_4 = arith.constant 0 : index
    %9 = vector.load %arg5[%c0_3, %c0_4] : memref<256x16xf32, #tpu.memory_space<vmem>>, vector<256x16xf32>
    %cst = arith.constant dense<0.000000e+00> : vector<256x16xf32>
    %10 = tpu.matmul %4, %8, %cst {dimension_numbers = #tpu.dot_dimension_numbers<[1], [0], [0], [1], [0, 0, 1, 1], [], []>} : vector<256x256xf32>, vector<256x16xf32>, vector<256x16xf32> -> vector<256x16xf32>
    %11 = arith.addf %9, %10 : vector<256x16xf32>
    %c0_5 = arith.constant 0 : index
    %c0_6 = arith.constant 0 : index
    %12 = vector.load %arg5[%c0_5, %c0_6] : memref<256x16xf32, #tpu.memory_space<vmem>>, vector<256x16xf32>
    tpu.vector_store %arg5[%c0_5, %c0_6], %11 {strides = array<i32>} : memref<256x16xf32, #tpu.memory_space<vmem>>, vector<256x16xf32>,
    %c0_i32_7 = arith.constant 0 : i32
    %13 = arith.cmpi eq, %arg1, %c0_i32_7 : i32
    %14 = arith.extui %13 : i1 to i32
    %c0_i32_8 = arith.constant 0 : i32
    %15 = arith.cmpi ne, %14, %c0_i32_8 : i32
    scf.if %15 {
      %c0_9 = arith.constant 0 : index
      %c0_10 = arith.constant 0 : index
      %16 = vector.load %arg5[%c0_9, %c0_10] : memref<256x16xf32, #tpu.memory_space<vmem>>, vector<256x16xf32>
      %c0_11 = arith.constant 0 : index
      %c0_12 = arith.constant 0 : index
      %17 = vector.load %arg4[%c0_11, %c0_12] : memref<1x16xf32, #tpu.memory_space<vmem>>, vector<1x16xf32>
      %18 = vector.broadcast %17 : vector<1x16xf32> to vector<256x16xf32>
      %19 = arith.addf %16, %18 : vector<256x16xf32>
      %c0_13 = arith.constant 0 : index
      %c0_14 = arith.constant 0 : index
      %20 = vector.load %arg5[%c0_13, %c0_14] : memref<256x16xf32, #tpu.memory_space<vmem>>, vector<256x16xf32>
      tpu.vector_store %arg5[%c0_13, %c0_14], %19 {strides = array<i32>} : memref<256x16xf32, #tpu.memory_space<vmem>>, vector<256x16xf32>,
    } else {
    }
    return
  }
  func.func @transform_0(%arg0: i32, %arg1: i32) -> (i32, i32) {
    %c0_i32 = arith.constant 0 : i32
    return %arg0, %arg1 : i32, i32
  }
  func.func @transform_1(%arg0: i32, %arg1: i32) -> (i32, i32) {
    %c0_i32 = arith.constant 0 : i32
    %c0_i32_0 = arith.constant 0 : i32
    %c0_i32_1 = arith.constant 0 : i32
    return %c0_i32, %c0_i32_0 : i32, i32
  }
  func.func @transform_2(%arg0: i32, %arg1: i32) -> (i32, i32) {
    %c0_i32 = arith.constant 0 : i32
    %c0_i32_0 = arith.constant 0 : i32
    %c0_i32_1 = arith.constant 0 : i32
    return %c0_i32, %c0_i32_0 : i32, i32
  }
  func.func @transform_3(%arg0: i32, %arg1: i32) -> (i32, i32) {
    %c0_i32 = arith.constant 0 : i32
    %c0_i32_0 = arith.constant 0 : i32
    return %arg0, %c0_i32 : i32, i32
  }
}

</mosaic_0001>

<bundles_post_ra>
// kernel: tpu_custom_call.1
= control target key start
LH: loop header
LB: loop body
LE: loop exit
PB: predicated region body
PF: predicated region fallthrough
CT: control target
= control target key end

     0   :  { %vm18_vm0 = vcmask 130048   ;;  %v744_v0 = vmov 0.0|0.0   ;;  %v745_v4 = vmov 0.0   ;;  %s1567_s1 = inlined_call_operand.vmem [shape: f32[256,16], index: 1, kind: input, shape index: {}]   ;;  %s1568_s3 = inlined_call_operand.vmem [shape: f32[256,16], index: 3, kind: output, shape index: {}]   ;;  %s1569_s0 = inlined_call_operand.vmem [shape: s8[256,256], index: 0, kind: input, shape index: {}]   ;;  %s1570_s2 = inlined_call_operand.vmem [shape: f32[1,16], index: 2, kind: input, shape index: {}]  }
   0x1   :  { %662 = vmatprep.subr.bf16.mxu0 %v744_v0  ;;  %710 = vmatprep.subr.bf16.mxu1 %v744_v0  ;;  %v197_v1 = vld [vmem:[%s1567_s1] sm:$0xff]  ;;  %v198_v2 = vld [vmem:[%s1567_s1 + $0x8] sm:$0xff]  ;;  %v199_v3 = vld [vmem:[%s1567_s1 + $0x10] sm:$0xff]  ;;  %19 = vst.msk [vmem:[%s1568_s3] sm:$0xff] %vm18_vm0, %v745_v4 }
   0x2   :  { %20 = vst.msk [vmem:[%s1568_s3 + $0x8] sm:$0xff] %vm18_vm0, %v745_v4  ;;  %21 = vst.msk [vmem:[%s1568_s3 + $0x10] sm:$0xff] %vm18_vm0, %v745_v4  ;;  %v663_v5 = vpack.c.bf16 %v198_v2, %v197_v1  ;;  %v200_v6 = vld [vmem:[%s1567_s1 + $0x18] sm:$0xff]  ;;  %v201_v8 = vld [vmem:[%s1567_s1 + $0x20] sm:$0xff] }
   0x3   :  { %22 = vst.msk [vmem:[%s1568_s3 + $0x18] sm:$0xff] %vm18_vm0, %v745_v4  ;;  %23 = vst.msk [vmem:[%s1568_s3 + $0x20] sm:$0xff] %vm18_vm0, %v745_v4  ;;  %v666_v7 = vpack.c.bf16 %v200_v6, %v199_v3  ;;  %v202_v9 = vld [vmem:[%s1567_s1 + $0x28] sm:$0xff]  ;;  %v203_v11 = vld [vmem:[%s1567_s1 + $0x30] sm:$0xff] }
   0x4   :  { %24 = vst.msk [vmem:[%s1568_s3 + $0x28] sm:$0xff] %vm18_vm0, %v745_v4  ;;  %25 = vst.msk [vmem:[%s1568_s3 + $0x30] sm:$0xff] %vm18_vm0, %v745_v4  ;;  %664 = vmatpush1.bf16.msra.mxu0 %v663_v5  ;;  %726 = vmatpush1.bf16.msra.mxu1 %v663_v5  ;;  %v669_v10 = vpack.c.bf16 %v202_v9, %v201_v8  ;;  %v204_v12 = vld [vmem:[%s1567_s1 + $0x38] sm:$0xff]  ;;  %v927_v13 = vld [vmem:[%s1569_s0 + $0x8] sm:$0xff] }
   0x5   :  { %26 = vst.msk [vmem:[%s1568_s3 + $0x38] sm:$0xff] %vm18_vm0, %v745_v4  ;;  %27 = vst.msk [vmem:[%s1568_s3 + $0x40] sm:$0xff] %vm18_vm0, %v745_v4  ;;  %665 = vmatprep.subr.bf16.mxu0 %v744_v0  ;;  %711 = vmatprep.subr.bf16.mxu1 %v744_v0  ;;  %v672_v14 = vpack.c.bf16 %v204_v12, %v203_v11  ;;  %v68_v15 = vunpack.c.0.s8 %v927_v13  ;;  %v933_v16 = vld [vmem:[%s1569_s0 + $0x48] sm:$0xff]  ;;  %v205_v17 = vld [vmem:[%s1567_s1 + $0x40] sm:$0xff]  ;;  %v70_v60 = vunpack.c.1.s8 %v927_v13  ;;  %v72_v5 = vunpack.c.2.s8 %v927_v13 }
   0x6   :  { %28 = vst.msk [vmem:[%s1568_s3 + $0x48] sm:$0xff] %vm18_vm0, %v745_v4  ;;  %29 = vst.msk [vmem:[%s1568_s3 + $0x50] sm:$0xff] %vm18_vm0, %v745_v4  ;;  %v206_v18 = vld [vmem:[%s1567_s1 + $0x48] sm:$0xff]  ;;  %v100_v19 = vunpack.c.0.s8 %v933_v16  ;;  %v207_v23 = vld [vmem:[%s1567_s1 + $0x50] sm:$0xff]  ;;  %v102_v61 = vunpack.c.1.s8 %v933_v16  ;;  %v104_v6 = vunpack.c.2.s8 %v933_v16  ;;  %v74_v12 = vunpack.c.3.s8 %v927_v13 }
   0x7   :  { %30 = vst.msk [vmem:[%s1568_s3 + $0x58] sm:$0xff] %vm18_vm0, %v745_v4  ;;  %31 = vst.msk [vmem:[%s1568_s3 + $0x60] sm:$0xff] %vm18_vm0, %v745_v4  ;;  %v132_v20 = vcvt.s32.f32 %v68_v15  ;;  %v675_v22 = vpack.c.bf16 %v206_v18, %v205_v17  ;;  %v208_v24 = vld [vmem:[%s1567_s1 + $0x58] sm:$0xff]  ;;  %v209_v26 = vld [vmem:[%s1567_s1 + $0x60] sm:$0xff]  ;;  %v134_v3 = vcvt.s32.f32 %v70_v60 }
   0x8   :  { %32 = vst.msk [vmem:[%s1568_s3 + $0x68] sm:$0xff] %vm18_vm0, %v745_v4  ;;  %33 = vst.msk [vmem:[%s1568_s3 + $0x70] sm:$0xff] %vm18_vm0, %v745_v4  ;;  %667 = vmatpush1.bf16.msra.mxu0 %v666_v7  ;;  %727 = vmatpush1.bf16.msra.mxu1 %v666_v7  ;;  %v164_v21 = vcvt.s32.f32 %v100_v19  ;;  %v678_v25 = vpack.c.bf16 %v208_v24, %v207_v23  ;;  %v210_v27 = vld [vmem:[%s1567_s1 + $0x68] sm:$0xff]  ;;  %v211_v29 = vld [vmem:[%s1567_s1 + $0x70] sm:$0xff]  ;;  %v168_v11 = vcvt.s32.f32 %v104_v6 }
   0x9   :  { %34 = vst.msk [vmem:[%s1568_s3 + $0x78] sm:$0xff] %vm18_vm0, %v745_v4  ;;  %35 = vst.msk [vmem:[%s1568_s3 + $0x80] sm:$0xff] %vm18_vm0, %v745_v4  ;;  %668 = vmatprep.subr.bf16.mxu0 %v744_v0  ;;  %712 = vmatprep.subr.bf16.mxu1 %v744_v0  ;;  %v681_v28 = vpack.c.bf16 %v210_v27, %v209_v26  ;;  %v212_v30 = vld [vmem:[%s1567_s1 + $0x78] sm:$0xff]  ;;  %v213_v32 = vld [vmem:[%s1567_s1 + $0x80] sm:$0xff] }
   0xa   :  { %36 = vst.msk [vmem:[%s1568_s3 + $0x88] sm:$0xff] %vm18_vm0, %v745_v4  ;;  %37 = vst.msk [vmem:[%s1568_s3 + $0x90] sm:$0xff] %vm18_vm0, %v745_v4  ;;  %325 = vmatprep.mubr.f32.mxu0 %v132_v20  ;;  %405 = vmatprep.mubr.f32.mxu1 %v164_v21  ;;  %v684_v31 = vpack.c.bf16 %v212_v30, %v211_v29  ;;  %v214_v33 = vld [vmem:[%s1567_s1 + $0x88] sm:$0xff]  ;;  %v215_v35 = vld [vmem:[%s1567_s1 + $0x90] sm:$0xff] }
   0xb   :  { %38 = vst.msk [vmem:[%s1568_s3 + $0x98] sm:$0xff] %vm18_vm0, %v745_v4  ;;  %39 = vst.msk [vmem:[%s1568_s3 + $0xa0] sm:$0xff] %vm18_vm0, %v745_v4  ;;  %v687_v34 = vpack.c.bf16 %v214_v33, %v213_v32  ;;  %v216_v36 = vld [vmem:[%s1567_s1 + $0x98] sm:$0xff]  ;;  %v217_v38 = vld [vmem:[%s1567_s1 + $0xa0] sm:$0xff] }
   0xc   :  { %40 = vst.msk [vmem:[%s1568_s3 + $0xa8] sm:$0xff] %vm18_vm0, %v745_v4  ;;  %41 = vst.msk [vmem:[%s1568_s3 + $0xb0] sm:$0xff] %vm18_vm0, %v745_v4  ;;  %670 = vmatpush1.bf16.msra.mxu0 %v669_v10  ;;  %728 = vmatpush1.bf16.msra.mxu1 %v669_v10  ;;  %v690_v37 = vpack.c.bf16 %v216_v36, %v215_v35  ;;  %v218_v39 = vld [vmem:[%s1567_s1 + $0xa8] sm:$0xff]  ;;  %v219_v41 = vld [vmem:[%s1567_s1 + $0xb0] sm:$0xff] }
   0xd   :  { %42 = vst.msk [vmem:[%s1568_s3 + $0xb8] sm:$0xff] %vm18_vm0, %v745_v4  ;;  %43 = vst.msk [vmem:[%s1568_s3 + $0xc0] sm:$0xff] %vm18_vm0, %v745_v4  ;;  %671 = vmatprep.subr.bf16.mxu0 %v744_v0  ;;  %713 = vmatprep.subr.bf16.mxu1 %v744_v0  ;;  %v693_v40 = vpack.c.bf16 %v218_v39, %v217_v38  ;;  %v220_v42 = vld [vmem:[%s1567_s1 + $0xb8] sm:$0xff]  ;;  %v221_v44 = vld [vmem:[%s1567_s1 + $0xc0] sm:$0xff] }
   0xe   :  { %44 = vst.msk [vmem:[%s1568_s3 + $0xc8] sm:$0xff] %vm18_vm0, %v745_v4  ;;  %45 = vst.msk [vmem:[%s1568_s3 + $0xd0] sm:$0xff] %vm18_vm0, %v745_v4  ;;  %v696_v43 = vpack.c.bf16 %v220_v42, %v219_v41  ;;  %v222_v45 = vld [vmem:[%s1567_s1 + $0xc8] sm:$0xff]  ;;  %v223_v47 = vld [vmem:[%s1567_s1 + $0xd0] sm:$0xff] }
   0xf   :  { %46 = vst.msk [vmem:[%s1568_s3 + $0xd8] sm:$0xff] %vm18_vm0, %v745_v4  ;;  %47 = vst.msk [vmem:[%s1568_s3 + $0xe0] sm:$0xff] %vm18_vm0, %v745_v4  ;;  %v699_v46 = vpack.c.bf16 %v222_v45, %v221_v44  ;;  %v224_v48 = vld [vmem:[%s1567_s1 + $0xd8] sm:$0xff]  ;;  %v225_v50 = vld [vmem:[%s1567_s1 + $0xe0] sm:$0xff] }
  0x10   :  { %48 = vst.msk [vmem:[%s1568_s3 + $0xe8] sm:$0xff] %vm18_vm0, %v745_v4  ;;  %49 = vst.msk [vmem:[%s1568_s3 + $0xf0] sm:$0xff] %vm18_vm0, %v745_v4  ;;  %673 = vmatpush1.bf16.msra.mxu0 %v672_v14  ;;  %729 = vmatpush1.bf16.msra.mxu1 %v672_v14  ;;  %v702_v49 = vpack.c.bf16 %v224_v48, %v223_v47  ;;  %v226_v51 = vld [vmem:[%s1567_s1 + $0xe8] sm:$0xff]  ;;  %v51_v53 = vld [vmem:[%s1569_s0] sm:$0xff]  ;;  %v106_v14 = vunpack.c.3.s8 %v933_v16 }
  0x11   :  { %50 = vst.msk [vmem:[%s1568_s3 + $0xf8] sm:$0xff] %vm18_vm0, %v745_v4  ;;  %674 = vmatprep.subr.bf16.mxu0 %v744_v0  ;;  %714 = vmatprep.subr.bf16.mxu1 %v744_v0  ;;  %v705_v52 = vpack.c.bf16 %v226_v51, %v225_v50  ;;  %v59_v54 = vld [vmem:[%s1569_s0 + $0x40] sm:$0xff]  ;;  %v227_v55 = vld [vmem:[%s1567_s1 + $0xf0] sm:$0xff]  ;;  %v228_v56 = vld [vmem:[%s1567_s1 + $0xf8] sm:$0xff]  ;;  %v67_v57 = vunpack.c.0.s8 %v51_v53  ;;  %v69_v1 = vunpack.c.1.s8 %v51_v53  ;;  %v166_v4 = vcvt.s32.f32 %v102_v61 }
  0x12   :  { %v99_v58 = vunpack.c.0.s8 %v59_v54  ;;  %v708_v59 = vpack.c.bf16 %v228_v56, %v227_v55  ;;  %v101_v2 = vunpack.c.1.s8 %v59_v54  ;;  %v71_v9 = vunpack.c.2.s8 %v51_v53  ;;  %v54_v15 = vld [vmem:[%s1569_s0 + $0x18] sm:$0xff]  ;;  %v53_v24 = vld [vmem:[%s1569_s0 + $0x10] sm:$0xff]  ;;  %v56_v50 = vld [vmem:[%s1569_s0 + $0x28] sm:$0xff] }
  0x13   :  { %v131_v62 = vcvt.s32.f32 %v67_v57  ;;  %v133_v7 = vcvt.s32.f32 %v69_v1  ;;  %v103_v10 = vunpack.c.2.s8 %v59_v54  ;;  %v62_v17 = vld [vmem:[%s1569_s0 + $0x58] sm:$0xff]  ;;  %v73_v20 = vunpack.c.3.s8 %v51_v53  ;;  %v64_v51 = vld [vmem:[%s1569_s0 + $0x68] sm:$0xff]  ;;  %v55_v60 = vld [vmem:[%s1569_s0 + $0x20] sm:$0xff] }
  0x14   :  { %676 = vmatpush1.bf16.msra.mxu0 %v675_v22  ;;  %730 = vmatpush1.bf16.msra.mxu1 %v675_v22  ;;  %v163_v63 = vcvt.s32.f32 %v99_v58  ;;  %v165_v8 = vcvt.s32.f32 %v101_v2  ;;  %v135_v18 = vcvt.s32.f32 %v71_v9  ;;  %v105_v21 = vunpack.c.3.s8 %v59_v54  ;;  %v63_v61 = vld [vmem:[%s1569_s0 + $0x60] sm:$0xff] }
  0x15   :  { %677 = vmatprep.subr.bf16.mxu0 %v744_v0  ;;  %715 = vmatprep.subr.bf16.mxu1 %v744_v0  ;;  %v167_v19 = vcvt.s32.f32 %v103_v10  ;;  %v138_v22 = vcvt.s32.f32 %v74_v12  ;;  %v170_v13 = vcvt.s32.f32 %v106_v14  ;;  %v76_v23 = vunpack.c.0.s8 %v54_v15 }
  0x16   :  { %v108_v16 = vunpack.c.0.s8 %v62_v17  ;;  %v137_v26 = vcvt.s32.f32 %v73_v20  ;;  %v169_v27 = vcvt.s32.f32 %v105_v21  ;;  %v78_v32 = vunpack.c.1.s8 %v54_v15 }
  0x17   :  { %v140_v30 = vcvt.s32.f32 %v76_v23  ;;  %v110_v33 = vunpack.c.1.s8 %v62_v17  ;;  %v77_v36 = vunpack.c.1.s8 %v53_v24  ;;  %v112_v41 = vunpack.c.2.s8 %v62_v17  ;;  %v58_v23 = vld [vmem:[%s1569_s0 + $0x38] sm:$0xff] }
  0x18   :  { %679 = vmatpush1.bf16.msra.mxu0 %v678_v25  ;;  %731 = vmatpush1.bf16.msra.mxu1 %v678_v25  ;;  %v61_v25 = vld [vmem:[%s1569_s0 + $0x50] sm:$0xff]  ;;  %v142_v38 = vcvt.s32.f32 %v78_v32  ;;  %v79_v44 = vunpack.c.2.s8 %v53_v24  ;;  %v82_v48 = vunpack.c.3.s8 %v54_v15  ;;  %v81_v54 = vunpack.c.3.s8 %v53_v24 }
  0x19   :  { %680 = vmatprep.subr.bf16.mxu0 %v744_v0  ;;  %716 = vmatprep.subr.bf16.mxu1 %v744_v0  ;;  %v107_v29 = vunpack.c.0.s8 %v61_v25  ;;  %v174_v39 = vcvt.s32.f32 %v110_v33  ;;  %v141_v42 = vcvt.s32.f32 %v77_v36  ;;  %v111_v45 = vunpack.c.2.s8 %v61_v25  ;;  %v57_v32 = vld [vmem:[%s1569_s0 + $0x30] sm:$0xff] }
  0x1a   :  { %v176_v47 = vcvt.s32.f32 %v112_v41  ;;  %v113_v55 = vunpack.c.3.s8 %v61_v25  ;;  %v146_v56 = vcvt.s32.f32 %v82_v48  ;;  %v84_v58 = vunpack.c.0.s8 %v56_v50  ;;  %v65_v33 = vld [vmem:[%s1569_s0 + $0x70] sm:$0xff] }
  0x1b   :  { %v171_v35 = vcvt.s32.f32 %v107_v29  ;;  %v175_v53 = vcvt.s32.f32 %v111_v45  ;;  %v83_v1 = vunpack.c.0.s8 %v55_v60  ;;  %v115_v2 = vunpack.c.0.s8 %v63_v61 }
  0x1c   :  { %682 = vmatpush1.bf16.msra.mxu0 %v681_v28  ;;  %732 = vmatpush1.bf16.msra.mxu1 %v681_v28  ;;  %v75_v28 = vunpack.c.0.s8 %v53_v24  ;;  %v118_v6 = vunpack.c.1.s8 %v64_v51  ;;  %v85_v9 = vunpack.c.1.s8 %v55_v60  ;;  %v117_v10 = vunpack.c.1.s8 %v63_v61 }
  0x1d   :  { %683 = vmatprep.subr.bf16.mxu0 %v744_v0  ;;  %717 = vmatprep.subr.bf16.mxu1 %v744_v0  ;;  %v88_v12 = vunpack.c.2.s8 %v56_v50  ;;  %v120_v14 = vunpack.c.2.s8 %v64_v51  ;;  %v91_v36 = vunpack.c.0.s8 %v57_v32  ;;  %v125_v45 = vunpack.c.1.s8 %v65_v33 }
  0x1e   :  { %v96_v48 = vunpack.c.2.s8 %v58_v23 }
  0x1f   :  { %v152_v20 = vcvt.s32.f32 %v88_v12  ;;  %v184_v21 = vcvt.s32.f32 %v120_v14 }
  0x20   :  { %685 = vmatpush1.bf16.msra.mxu0 %v684_v31  ;;  %733 = vmatpush1.bf16.msra.mxu1 %v684_v31  ;;  %v172_v31 = vcvt.s32.f32 %v108_v16  ;;  %v66_v16 = vld [vmem:[%s1569_s0 + $0x78] sm:$0xff] }
  0x21   :  { %686 = vmatprep.subr.bf16.mxu0 %v744_v0  ;;  %718 = vmatprep.subr.bf16.mxu1 %v744_v0  ;;  %v126_v41 = vunpack.c.1.s8 %v66_v16 }
  0x24   :  { %688 = vmatpush1.bf16.msra.mxu0 %v687_v34  ;;  %734 = vmatpush1.bf16.msra.mxu1 %v687_v34  ;;  %v139_v34 = vcvt.s32.f32 %v75_v28 }
  0x25   :  { %689 = vmatprep.subr.bf16.mxu0 %v744_v0  ;;  %719 = vmatprep.subr.bf16.mxu1 %v744_v0 }
  0x28   :  { %691 = vmatpush1.bf16.msra.mxu0 %v690_v37  ;;  %735 = vmatpush1.bf16.msra.mxu1 %v690_v37  ;;  %v109_v37 = vunpack.c.1.s8 %v61_v25 }
  0x29   :  { %692 = vmatprep.subr.bf16.mxu0 %v744_v0  ;;  %720 = vmatprep.subr.bf16.mxu1 %v744_v0 }
  0x2c   :  { %694 = vmatpush1.bf16.msra.mxu0 %v693_v40  ;;  %736 = vmatpush1.bf16.msra.mxu1 %v693_v40  ;;  %v80_v40 = vunpack.c.2.s8 %v54_v15  ;;  %v149_v15 = vcvt.s32.f32 %v85_v9 }
  0x2d   :  { %695 = vmatprep.subr.bf16.mxu0 %v744_v0  ;;  %721 = vmatprep.subr.bf16.mxu1 %v744_v0 }
  0x30   :  { %697 = vmatpush1.bf16.msra.mxu0 %v696_v43  ;;  %737 = vmatpush1.bf16.msra.mxu1 %v696_v43  ;;  %v173_v43 = vcvt.s32.f32 %v109_v37  ;;  %v123_v37 = vunpack.c.0.s8 %v65_v33 }
  0x31   :  { %698 = vmatprep.subr.bf16.mxu0 %v744_v0  ;;  %722 = vmatprep.subr.bf16.mxu1 %v744_v0 }
  0x34   :  { %700 = vmatpush1.bf16.msra.mxu0 %v699_v46  ;;  %738 = vmatpush1.bf16.msra.mxu1 %v699_v46  ;;  %v144_v46 = vcvt.s32.f32 %v80_v40  ;;  %v94_v40 = vunpack.c.1.s8 %v58_v23 }
  0x35   :  { %701 = vmatprep.subr.bf16.mxu0 %v744_v0  ;;  %723 = vmatprep.subr.bf16.mxu1 %v744_v0 }
  0x38   :  { %703 = vmatpush1.bf16.msra.mxu0 %v702_v49  ;;  %739 = vmatpush1.bf16.msra.mxu1 %v702_v49  ;;  %v114_v49 = vunpack.c.3.s8 %v62_v17  ;;  %v181_v17 = vcvt.s32.f32 %v117_v10 }
  0x39   :  { %704 = vmatprep.subr.bf16.mxu0 %v744_v0  ;;  %724 = vmatprep.subr.bf16.mxu1 %v744_v0 }
  0x3a   :  { %v178_v57 = vcvt.s32.f32 %v114_v49  ;;  %v128_v49 = vunpack.c.2.s8 %v66_v16 }
  0x3c   :  { %706 = vmatpush1.bf16.msra.mxu0 %v705_v52  ;;  %740 = vmatpush1.bf16.msra.mxu1 %v705_v52  ;;  %v143_v52 = vcvt.s32.f32 %v79_v44  ;;  %v93_v44 = vunpack.c.1.s8 %v57_v32 }
  0x3d   :  { %707 = vmatprep.subr.bf16.mxu0 %v744_v0  ;;  %725 = vmatprep.subr.bf16.mxu1 %v744_v0  ;;  %v136_v0 = vcvt.s32.f32 %v72_v5  ;;  %v86_v5 = vunpack.c.1.s8 %v56_v50 }
  0x40   :  { %709 = vmatpush1.bf16.msra.mxu0 %v708_v59  ;;  %741 = vmatpush1.bf16.msra.mxu1 %v708_v59  ;;  %v116_v59 = vunpack.c.0.s8 %v64_v51 }
  0x43   :  { %326 = vmatmul.mubr.f32.vlgmr.msra.gmra.mrb[0].mxu0 %v131_v62  ;;  %406 = vmatmul.mubr.f32.vlgmr.msra.gmra.mrb[0].mxu1 %v163_v63  ;;  %v145_v62 = vcvt.s32.f32 %v81_v54  ;;  %v177_v63 = vcvt.s32.f32 %v113_v55  ;;  %v160_v54 = vcvt.s32.f32 %v96_v48  ;;  %v192_v55 = vcvt.s32.f32 %v128_v49 }
  0x44   :  { %330 = vmatprep.mubr.f32.mxu0 %v134_v3  ;;  %410 = vmatprep.mubr.f32.mxu1 %v166_v4  ;;  %v148_v3 = vcvt.s32.f32 %v84_v58  ;;  %v180_v4 = vcvt.s32.f32 %v116_v59 }
  0x47   :  { %331 = vmatmul.mubr.f32.gmra.mrb[2].mxu0 %v133_v7  ;;  %411 = vmatmul.mubr.f32.gmra.mrb[2].mxu1 %v165_v8  ;;  %v147_v7 = vcvt.s32.f32 %v83_v1  ;;  %v179_v8 = vcvt.s32.f32 %v115_v2 }
  0x48   :  { %335 = vmatprep.mubr.f32.mxu0 %v136_v0  ;;  %415 = vmatprep.mubr.f32.mxu1 %v168_v11  ;;  %v150_v0 = vcvt.s32.f32 %v86_v5  ;;  %v182_v11 = vcvt.s32.f32 %v118_v6 }
  0x4b   :  { %336 = vmatmul.mubr.f32.gmra.mrb[4].mxu0 %v135_v18  ;;  %416 = vmatmul.mubr.f32.gmra.mrb[4].mxu1 %v167_v19  ;;  %v87_v18 = vunpack.c.2.s8 %v55_v60  ;;  %v119_v19 = vunpack.c.2.s8 %v63_v61 }
  0x4c   :  { %340 = vmatprep.mubr.f32.mxu0 %v138_v22  ;;  %420 = vmatprep.mubr.f32.mxu1 %v170_v13  ;;  %v90_v22 = vunpack.c.3.s8 %v56_v50  ;;  %v122_v13 = vunpack.c.3.s8 %v64_v51  ;;  %v157_v50 = vcvt.s32.f32 %v93_v44  ;;  %v189_v51 = vcvt.s32.f32 %v125_v45 }
  0x4d   :  { %v151_v24 = vcvt.s32.f32 %v87_v18  ;;  %v183_v25 = vcvt.s32.f32 %v119_v19 }
  0x4e   :  { %v154_v28 = vcvt.s32.f32 %v90_v22  ;;  %v186_v29 = vcvt.s32.f32 %v122_v13  ;;  %v1119_v22 = vld [vmem:[%s1570_s2] ss:$0 sm:$0xff] }
  0x4f   :  { %341 = vmatmul.mubr.f32.gmra.mrb[6].mxu0 %v137_v26  ;;  %421 = vmatmul.mubr.f32.gmra.mrb[6].mxu1 %v169_v27  ;;  %v89_v26 = vunpack.c.3.s8 %v55_v60  ;;  %v121_v27 = vunpack.c.3.s8 %v63_v61  ;;  %v97_v60 = vunpack.c.3.s8 %v57_v32  ;;  %v129_v61 = vunpack.c.3.s8 %v65_v33 }
  0x50   :  { %345 = vmatprep.mubr.f32.mxu0 %v140_v30  ;;  %425 = vmatprep.mubr.f32.mxu1 %v172_v31  ;;  %v92_v30 = vunpack.c.0.s8 %v58_v23  ;;  %v124_v31 = vunpack.c.0.s8 %v66_v16 }
  0x51   :  { %v161_v1 = vcvt.s32.f32 %v97_v60  ;;  %v193_v2 = vcvt.s32.f32 %v129_v61 }
  0x53   :  { %346 = vmatmul.mubr.f32.gmra.mrb[8].mxu0 %v139_v34  ;;  %426 = vmatmul.mubr.f32.gmra.mrb[8].mxu1 %v171_v35  ;;  %v153_v34 = vcvt.s32.f32 %v89_v26  ;;  %v185_v35 = vcvt.s32.f32 %v121_v27  ;;  %v232_v27 = vld [vmem:[%s1568_s3 + $0x18] sm:$0xff] }
  0x54   :  { %350 = vmatprep.mubr.f32.mxu0 %v142_v38  ;;  %430 = vmatprep.mubr.f32.mxu1 %v174_v39  ;;  %v156_v38 = vcvt.s32.f32 %v92_v30  ;;  %v188_v39 = vcvt.s32.f32 %v124_v31  ;;  %v248_v30 = vld [vmem:[%s1568_s3 + $0x98] sm:$0xff] }
  0x57   :  { %351 = vmatmul.mubr.f32.gmra.mrb[10].mxu0 %v141_v42  ;;  %431 = vmatmul.mubr.f32.gmra.mrb[10].mxu1 %v173_v43  ;;  %v155_v42 = vcvt.s32.f32 %v91_v36  ;;  %v187_v43 = vcvt.s32.f32 %v123_v37 }
  0x58   :  { %355 = vmatprep.mubr.f32.mxu0 %v144_v46  ;;  %435 = vmatprep.mubr.f32.mxu1 %v176_v47  ;;  %v158_v46 = vcvt.s32.f32 %v94_v40  ;;  %v190_v47 = vcvt.s32.f32 %v126_v41 }
  0x5b   :  { %356 = vmatmul.mubr.f32.gmra.mrb[12].mxu0 %v143_v52  ;;  %436 = vmatmul.mubr.f32.gmra.mrb[12].mxu1 %v175_v53  ;;  %v95_v52 = vunpack.c.2.s8 %v57_v32  ;;  %v127_v53 = vunpack.c.2.s8 %v65_v33 }
  0x5c   :  { %360 = vmatprep.mubr.f32.mxu0 %v146_v56  ;;  %440 = vmatprep.mubr.f32.mxu1 %v178_v57  ;;  %v98_v56 = vunpack.c.3.s8 %v58_v23  ;;  %v130_v57 = vunpack.c.3.s8 %v66_v16 }
  0x5d   :  { %v159_v58 = vcvt.s32.f32 %v95_v52  ;;  %v191_v59 = vcvt.s32.f32 %v127_v53 }
  0x5f   :  { %361 = vmatmul.mubr.f32.gmra.mrb[14].mxu0 %v145_v62  ;;  %441 = vmatmul.mubr.f32.gmra.mrb[14].mxu1 %v177_v63  ;;  %v162_v62 = vcvt.s32.f32 %v98_v56  ;;  %v194_v63 = vcvt.s32.f32 %v130_v57 }
  0x60   :  { %365 = vmatprep.mubr.f32.mxu0 %v148_v3  ;;  %445 = vmatprep.mubr.f32.mxu1 %v180_v4  ;;  %v229_v3 = vld [vmem:[%s1568_s3] sm:$0xff] }
  0x61   :  { %v245_v4 = vld [vmem:[%s1568_s3 + $0x80] sm:$0xff] }
  0x63   :  { %366 = vmatmul.mubr.f32.gmra.mrb[16].mxu0 %v147_v7  ;;  %446 = vmatmul.mubr.f32.gmra.mrb[16].mxu1 %v179_v8 }
  0x64   :  { %370 = vmatprep.mubr.f32.mxu0 %v150_v0  ;;  %450 = vmatprep.mubr.f32.mxu1 %v182_v11  ;;  %v230_v0 = vld [vmem:[%s1568_s3 + $0x8] sm:$0xff] }
  0x65   :  { %v246_v11 = vld [vmem:[%s1568_s3 + $0x88] sm:$0xff] }
  0x67   :  { %371 = vmatmul.mubr.f32.gmra.mrb[18].mxu0 %v149_v15  ;;  %451 = vmatmul.mubr.f32.gmra.mrb[18].mxu1 %v181_v17 }
  0x68   :  { %375 = vmatprep.mubr.f32.mxu0 %v152_v20  ;;  %455 = vmatprep.mubr.f32.mxu1 %v184_v21  ;;  %v231_v20 = vld [vmem:[%s1568_s3 + $0x10] sm:$0xff] }
  0x69   :  { %v247_v21 = vld [vmem:[%s1568_s3 + $0x90] sm:$0xff] }
  0x6b   :  { %376 = vmatmul.mubr.f32.gmra.mrb[20].mxu0 %v151_v24  ;;  %456 = vmatmul.mubr.f32.gmra.mrb[20].mxu1 %v183_v25 }
  0x6c   :  { %380 = vmatprep.mubr.f32.mxu0 %v154_v28  ;;  %460 = vmatprep.mubr.f32.mxu1 %v186_v29 }
  0x6f   :  { %381 = vmatmul.mubr.f32.gmra.mrb[22].mxu0 %v153_v34  ;;  %461 = vmatmul.mubr.f32.gmra.mrb[22].mxu1 %v185_v35 }
  0x70   :  { %385 = vmatprep.mubr.f32.mxu0 %v156_v38  ;;  %465 = vmatprep.mubr.f32.mxu1 %v188_v39  ;;  %v233_v39 = vld [vmem:[%s1568_s3 + $0x20] sm:$0xff] }
  0x73   :  { %386 = vmatmul.mubr.f32.gmra.mrb[24].mxu0 %v155_v42  ;;  %466 = vmatmul.mubr.f32.gmra.mrb[24].mxu1 %v187_v43  ;;  %v249_v42 = vld [vmem:[%s1568_s3 + $0xa0] sm:$0xff] }
  0x74   :  { %390 = vmatprep.mubr.f32.mxu0 %v158_v46  ;;  %470 = vmatprep.mubr.f32.mxu1 %v190_v47 }
  0x77   :  { %391 = vmatmul.mubr.f32.gmra.mrb[26].mxu0 %v157_v50  ;;  %471 = vmatmul.mubr.f32.gmra.mrb[26].mxu1 %v189_v51  ;;  %v234_v51 = vld [vmem:[%s1568_s3 + $0x28] sm:$0xff] }
  0x78   :  { %395 = vmatprep.mubr.f32.mxu0 %v160_v54  ;;  %475 = vmatprep.mubr.f32.mxu1 %v192_v55  ;;  %v250_v54 = vld [vmem:[%s1568_s3 + $0xa8] sm:$0xff] }
  0x7b   :  { %396 = vmatmul.mubr.f32.gmra.mrb[28].mxu0 %v159_v58  ;;  %476 = vmatmul.mubr.f32.gmra.mrb[28].mxu1 %v191_v59 }
  0x7c   :  { %400 = vmatprep.mubr.f32.mxu0 %v162_v62  ;;  %480 = vmatprep.mubr.f32.mxu1 %v194_v63  ;;  %v235_v63 = vld [vmem:[%s1568_s3 + $0x30] sm:$0xff] }
  0x7f   :  { %401 = vmatmul.mubr.f32.gmra.mrb[30].mxu0 %v161_v1  ;;  %481 = vmatmul.mubr.f32.gmra.mrb[30].mxu1 %v193_v2 }
 0x116   :  { %v327_v5 = vpop.f32.mrb[0].mxu0  ;;  %v407_v6 = vpop.f32.mrb[0].mxu1 }
 0x117   :  { %v486_v7 = vadd.f32 %v327_v5, %v229_v3  ;;  %v502_v8 = vadd.f32 %v407_v6, %v245_v4  ;;  %v329_v9 = vpop.f32.mrb[1].mxu0  ;;  %v409_v10 = vpop.f32.mrb[1].mxu1  ;;  %v251_v3 = vld [vmem:[%s1568_s3 + $0xb0] sm:$0xff] }
 0x119   :  { %519 = vst.msk [vmem:[%s1568_s3] sm:$0xff] %vm18_vm0, %v486_v7  ;;  %535 = vst.msk [vmem:[%s1568_s3 + $0x80] sm:$0xff] %vm18_vm0, %v502_v8 }
 0x11a   :  { %v332_v12 = vpop.f32.mrb[2].mxu0  ;;  %v412_v14 = vpop.f32.mrb[2].mxu1 }
 0x11b   :  { %v487_v15 = vadd.f32 %v332_v12, %v230_v0  ;;  %v503_v17 = vadd.f32 %v412_v14, %v246_v11  ;;  %v334_v18 = vpop.f32.mrb[3].mxu0  ;;  %v414_v19 = vpop.f32.mrb[3].mxu1  ;;  %v236_v11 = vld [vmem:[%s1568_s3 + $0x38] sm:$0xff] }
 0x11d   :  { %520 = vst.msk [vmem:[%s1568_s3 + $0x8] sm:$0xff] %vm18_vm0, %v487_v15  ;;  %536 = vst.msk [vmem:[%s1568_s3 + $0x88] sm:$0xff] %vm18_vm0, %v503_v17  ;;  %v252_v15 = vld [vmem:[%s1568_s3 + $0xb8] sm:$0xff] }
 0x11e   :  { %v337_v13 = vpop.f32.mrb[4].mxu0  ;;  %v417_v23 = vpop.f32.mrb[4].mxu1 }
 0x11f   :  { %v488_v16 = vadd.f32 %v337_v13, %v231_v20  ;;  %v504_v24 = vadd.f32 %v417_v23, %v247_v21  ;;  %v339_v25 = vpop.f32.mrb[5].mxu0  ;;  %v419_v26 = vpop.f32.mrb[5].mxu1 }
 0x120   :  { %v554_v28 = vld [vmem:[%s1568_s3] sm:$0xff] }
 0x121   :  { %v570_v29 = vld [vmem:[%s1568_s3 + $0x80] sm:$0xff]  ;;  %v593_v31 = vadd.f32 %v1119_v22, %v554_v28  ;;  %521 = vst.msk [vmem:[%s1568_s3 + $0x10] sm:$0xff] %vm18_vm0, %v488_v16  ;;  %537 = vst.msk [vmem:[%s1568_s3 + $0x90] sm:$0xff] %vm18_vm0, %v504_v24 }
 0x122   :  { %v609_v32 = vadd.f32 %v1119_v22, %v570_v29  ;;  %v342_v33 = vpop.f32.mrb[6].mxu0  ;;  %v422_v34 = vpop.f32.mrb[6].mxu1  ;;  %v237_v24 = vld [vmem:[%s1568_s3 + $0x40] sm:$0xff] }
 0x123   :  { %625 = vst.msk [vmem:[%s1568_s3] sm:$0xff] %vm18_vm0, %v593_v31  ;;  %v489_v35 = vadd.f32 %v342_v33, %v232_v27  ;;  %v505_v36 = vadd.f32 %v422_v34, %v248_v30  ;;  %v344_v37 = vpop.f32.mrb[7].mxu0  ;;  %v424_v38 = vpop.f32.mrb[7].mxu1  ;;  %v253_v27 = vld [vmem:[%s1568_s3 + $0xc0] sm:$0xff] }
 0x124   :  { %641 = vst.msk [vmem:[%s1568_s3 + $0x80] sm:$0xff] %vm18_vm0, %v609_v32  ;;  %v555_v40 = vld [vmem:[%s1568_s3 + $0x8] sm:$0xff] }
 0x125   :  { %v571_v41 = vld [vmem:[%s1568_s3 + $0x88] sm:$0xff]  ;;  %v594_v43 = vadd.f32 %v1119_v22, %v555_v40  ;;  %522 = vst.msk [vmem:[%s1568_s3 + $0x18] sm:$0xff] %vm18_vm0, %v489_v35  ;;  %538 = vst.msk [vmem:[%s1568_s3 + $0x98] sm:$0xff] %vm18_vm0, %v505_v36 }
 0x126   :  { %v610_v44 = vadd.f32 %v1119_v22, %v571_v41  ;;  %v347_v45 = vpop.f32.mrb[8].mxu0  ;;  %v427_v46 = vpop.f32.mrb[8].mxu1  ;;  %v238_v36 = vld [vmem:[%s1568_s3 + $0x48] sm:$0xff] }
 0x127   :  { %626 = vst.msk [vmem:[%s1568_s3 + $0x8] sm:$0xff] %vm18_vm0, %v594_v43  ;;  %v490_v47 = vadd.f32 %v347_v45, %v233_v39  ;;  %v506_v48 = vadd.f32 %v427_v46, %v249_v42  ;;  %v349_v49 = vpop.f32.mrb[9].mxu0  ;;  %v429_v50 = vpop.f32.mrb[9].mxu1  ;;  %v254_v39 = vld [vmem:[%s1568_s3 + $0xc8] sm:$0xff] }
 0x128   :  { %642 = vst.msk [vmem:[%s1568_s3 + $0x88] sm:$0xff] %vm18_vm0, %v610_v44  ;;  %v556_v52 = vld [vmem:[%s1568_s3 + $0x10] sm:$0xff] }
 0x129   :  { %v572_v53 = vld [vmem:[%s1568_s3 + $0x90] sm:$0xff]  ;;  %v595_v55 = vadd.f32 %v1119_v22, %v556_v52  ;;  %523 = vst.msk [vmem:[%s1568_s3 + $0x20] sm:$0xff] %vm18_vm0, %v490_v47  ;;  %539 = vst.msk [vmem:[%s1568_s3 + $0xa0] sm:$0xff] %vm18_vm0, %v506_v48 }
 0x12a   :  { %v611_v56 = vadd.f32 %v1119_v22, %v572_v53  ;;  %v352_v57 = vpop.f32.mrb[10].mxu0  ;;  %v432_v58 = vpop.f32.mrb[10].mxu1  ;;  %v239_v48 = vld [vmem:[%s1568_s3 + $0x50] sm:$0xff] }
 0x12b   :  { %627 = vst.msk [vmem:[%s1568_s3 + $0x10] sm:$0xff] %vm18_vm0, %v595_v55  ;;  %v491_v59 = vadd.f32 %v352_v57, %v234_v51  ;;  %v507_v60 = vadd.f32 %v432_v58, %v250_v54  ;;  %v354_v61 = vpop.f32.mrb[11].mxu0  ;;  %v434_v62 = vpop.f32.mrb[11].mxu1  ;;  %v255_v51 = vld [vmem:[%s1568_s3 + $0xd0] sm:$0xff] }
 0x12c   :  { %643 = vst.msk [vmem:[%s1568_s3 + $0x90] sm:$0xff] %vm18_vm0, %v611_v56  ;;  %v557_v1 = vld [vmem:[%s1568_s3 + $0x18] sm:$0xff] }
 0x12d   :  { %v573_v2 = vld [vmem:[%s1568_s3 + $0x98] sm:$0xff]  ;;  %v596_v4 = vadd.f32 %v1119_v22, %v557_v1  ;;  %524 = vst.msk [vmem:[%s1568_s3 + $0x28] sm:$0xff] %vm18_vm0, %v491_v59  ;;  %540 = vst.msk [vmem:[%s1568_s3 + $0xa8] sm:$0xff] %vm18_vm0, %v507_v60 }
 0x12e   :  { %v612_v5 = vadd.f32 %v1119_v22, %v573_v2  ;;  %v357_v6 = vpop.f32.mrb[12].mxu0  ;;  %v437_v7 = vpop.f32.mrb[12].mxu1  ;;  %v240_v60 = vld [vmem:[%s1568_s3 + $0x58] sm:$0xff] }
 0x12f   :  { %628 = vst.msk [vmem:[%s1568_s3 + $0x18] sm:$0xff] %vm18_vm0, %v596_v4  ;;  %v492_v8 = vadd.f32 %v357_v6, %v235_v63  ;;  %v508_v9 = vadd.f32 %v437_v7, %v251_v3  ;;  %v359_v10 = vpop.f32.mrb[13].mxu0  ;;  %v439_v0 = vpop.f32.mrb[13].mxu1  ;;  %v256_v63 = vld [vmem:[%s1568_s3 + $0xd8] sm:$0xff] }
 0x130   :  { %644 = vst.msk [vmem:[%s1568_s3 + $0x98] sm:$0xff] %vm18_vm0, %v612_v5  ;;  %v558_v12 = vld [vmem:[%s1568_s3 + $0x20] sm:$0xff] }
 0x131   :  { %v574_v14 = vld [vmem:[%s1568_s3 + $0xa0] sm:$0xff]  ;;  %v597_v17 = vadd.f32 %v1119_v22, %v558_v12  ;;  %525 = vst.msk [vmem:[%s1568_s3 + $0x30] sm:$0xff] %vm18_vm0, %v492_v8  ;;  %541 = vst.msk [vmem:[%s1568_s3 + $0xb0] sm:$0xff] %vm18_vm0, %v508_v9 }
 0x132   :  { %v613_v18 = vadd.f32 %v1119_v22, %v574_v14  ;;  %v362_v19 = vpop.f32.mrb[14].mxu0  ;;  %v442_v20 = vpop.f32.mrb[14].mxu1  ;;  %v241_v9 = vld [vmem:[%s1568_s3 + $0x60] sm:$0xff] }
 0x133   :  { %629 = vst.msk [vmem:[%s1568_s3 + $0x20] sm:$0xff] %vm18_vm0, %v597_v17  ;;  %v493_v21 = vadd.f32 %v362_v19, %v236_v11  ;;  %v509_v13 = vadd.f32 %v442_v20, %v252_v15  ;;  %v364_v23 = vpop.f32.mrb[15].mxu0  ;;  %v444_v16 = vpop.f32.mrb[15].mxu1  ;;  %v257_v11 = vld [vmem:[%s1568_s3 + $0xe0] sm:$0xff] }
 0x134   :  { %645 = vst.msk [vmem:[%s1568_s3 + $0xa0] sm:$0xff] %vm18_vm0, %v613_v18  ;;  %v559_v25 = vld [vmem:[%s1568_s3 + $0x28] sm:$0xff] }
 0x135   :  { %v575_v26 = vld [vmem:[%s1568_s3 + $0xa8] sm:$0xff]  ;;  %v598_v28 = vadd.f32 %v1119_v22, %v559_v25  ;;  %526 = vst.msk [vmem:[%s1568_s3 + $0x38] sm:$0xff] %vm18_vm0, %v493_v21  ;;  %542 = vst.msk [vmem:[%s1568_s3 + $0xb8] sm:$0xff] %vm18_vm0, %v509_v13 }
 0x136   :  { %v614_v29 = vadd.f32 %v1119_v22, %v575_v26  ;;  %v367_v30 = vpop.f32.mrb[16].mxu0  ;;  %v447_v31 = vpop.f32.mrb[16].mxu1  ;;  %v242_v13 = vld [vmem:[%s1568_s3 + $0x68] sm:$0xff] }
 0x137   :  { %630 = vst.msk [vmem:[%s1568_s3 + $0x28] sm:$0xff] %vm18_vm0, %v598_v28  ;;  %v494_v32 = vadd.f32 %v367_v30, %v237_v24  ;;  %v510_v33 = vadd.f32 %v447_v31, %v253_v27  ;;  %v369_v34 = vpop.f32.mrb[17].mxu0  ;;  %v449_v35 = vpop.f32.mrb[17].mxu1  ;;  %v258_v24 = vld [vmem:[%s1568_s3 + $0xe8] sm:$0xff] }
 0x138   :  { %646 = vst.msk [vmem:[%s1568_s3 + $0xa8] sm:$0xff] %vm18_vm0, %v614_v29  ;;  %v560_v37 = vld [vmem:[%s1568_s3 + $0x30] sm:$0xff] }
 0x139   :  { %v576_v38 = vld [vmem:[%s1568_s3 + $0xb0] sm:$0xff]  ;;  %v599_v40 = vadd.f32 %v1119_v22, %v560_v37  ;;  %527 = vst.msk [vmem:[%s1568_s3 + $0x40] sm:$0xff] %vm18_vm0, %v494_v32  ;;  %543 = vst.msk [vmem:[%s1568_s3 + $0xc0] sm:$0xff] %vm18_vm0, %v510_v33 }
 0x13a   :  { %v615_v41 = vadd.f32 %v1119_v22, %v576_v38  ;;  %v372_v42 = vpop.f32.mrb[18].mxu0  ;;  %v452_v43 = vpop.f32.mrb[18].mxu1  ;;  %v243_v33 = vld [vmem:[%s1568_s3 + $0x70] sm:$0xff] }
 0x13b   :  { %631 = vst.msk [vmem:[%s1568_s3 + $0x30] sm:$0xff] %vm18_vm0, %v599_v40  ;;  %v495_v44 = vadd.f32 %v372_v42, %v238_v36  ;;  %v511_v45 = vadd.f32 %v452_v43, %v254_v39  ;;  %v374_v46 = vpop.f32.mrb[19].mxu0  ;;  %v454_v47 = vpop.f32.mrb[19].mxu1  ;;  %v259_v36 = vld [vmem:[%s1568_s3 + $0xf0] sm:$0xff] }
 0x13c   :  { %647 = vst.msk [vmem:[%s1568_s3 + $0xb0] sm:$0xff] %vm18_vm0, %v615_v41  ;;  %v561_v49 = vld [vmem:[%s1568_s3 + $0x38] sm:$0xff] }
 0x13d   :  { %v577_v50 = vld [vmem:[%s1568_s3 + $0xb8] sm:$0xff]  ;;  %v600_v52 = vadd.f32 %v1119_v22, %v561_v49  ;;  %528 = vst.msk [vmem:[%s1568_s3 + $0x48] sm:$0xff] %vm18_vm0, %v495_v44  ;;  %544 = vst.msk [vmem:[%s1568_s3 + $0xc8] sm:$0xff] %vm18_vm0, %v511_v45 }
 0x13e   :  { %v616_v53 = vadd.f32 %v1119_v22, %v577_v50  ;;  %v377_v54 = vpop.f32.mrb[20].mxu0  ;;  %v457_v55 = vpop.f32.mrb[20].mxu1  ;;  %v244_v45 = vld [vmem:[%s1568_s3 + $0x78] sm:$0xff] }
 0x13f   :  { %632 = vst.msk [vmem:[%s1568_s3 + $0x38] sm:$0xff] %vm18_vm0, %v600_v52  ;;  %v496_v56 = vadd.f32 %v377_v54, %v239_v48  ;;  %v512_v57 = vadd.f32 %v457_v55, %v255_v51  ;;  %v379_v58 = vpop.f32.mrb[21].mxu0  ;;  %v459_v59 = vpop.f32.mrb[21].mxu1  ;;  %v260_v48 = vld [vmem:[%s1568_s3 + $0xf8] sm:$0xff] }
 0x140   :  { %648 = vst.msk [vmem:[%s1568_s3 + $0xb8] sm:$0xff] %vm18_vm0, %v616_v53  ;;  %v562_v61 = vld [vmem:[%s1568_s3 + $0x40] sm:$0xff] }
 0x141   :  { %v578_v62 = vld [vmem:[%s1568_s3 + $0xc0] sm:$0xff]  ;;  %v601_v1 = vadd.f32 %v1119_v22, %v562_v61  ;;  %529 = vst.msk [vmem:[%s1568_s3 + $0x50] sm:$0xff] %vm18_vm0, %v496_v56  ;;  %545 = vst.msk [vmem:[%s1568_s3 + $0xd0] sm:$0xff] %vm18_vm0, %v512_v57 }
 0x142   :  { %v617_v2 = vadd.f32 %v1119_v22, %v578_v62  ;;  %v382_v3 = vpop.f32.mrb[22].mxu0  ;;  %v462_v4 = vpop.f32.mrb[22].mxu1 }
 0x143   :  { %633 = vst.msk [vmem:[%s1568_s3 + $0x40] sm:$0xff] %vm18_vm0, %v601_v1  ;;  %v497_v5 = vadd.f32 %v382_v3, %v240_v60  ;;  %v513_v6 = vadd.f32 %v462_v4, %v256_v63  ;;  %v384_v7 = vpop.f32.mrb[23].mxu0  ;;  %v464_v8 = vpop.f32.mrb[23].mxu1 }
 0x144   :  { %649 = vst.msk [vmem:[%s1568_s3 + $0xc0] sm:$0xff] %vm18_vm0, %v617_v2  ;;  %v563_v10 = vld [vmem:[%s1568_s3 + $0x48] sm:$0xff] }
 0x145   :  { %v579_v0 = vld [vmem:[%s1568_s3 + $0xc8] sm:$0xff]  ;;  %v602_v12 = vadd.f32 %v1119_v22, %v563_v10  ;;  %530 = vst.msk [vmem:[%s1568_s3 + $0x58] sm:$0xff] %vm18_vm0, %v497_v5  ;;  %546 = vst.msk [vmem:[%s1568_s3 + $0xd8] sm:$0xff] %vm18_vm0, %v513_v6 }
 0x146   :  { %v618_v14 = vadd.f32 %v1119_v22, %v579_v0  ;;  %v387_v15 = vpop.f32.mrb[24].mxu0  ;;  %v467_v17 = vpop.f32.mrb[24].mxu1 }
 0x147   :  { %634 = vst.msk [vmem:[%s1568_s3 + $0x48] sm:$0xff] %vm18_vm0, %v602_v12  ;;  %v498_v18 = vadd.f32 %v387_v15, %v241_v9  ;;  %v514_v19 = vadd.f32 %v467_v17, %v257_v11  ;;  %v389_v20 = vpop.f32.mrb[25].mxu0  ;;  %v469_v21 = vpop.f32.mrb[25].mxu1 }
 0x148   :  { %650 = vst.msk [vmem:[%s1568_s3 + $0xc8] sm:$0xff] %vm18_vm0, %v618_v14  ;;  %v564_v23 = vld [vmem:[%s1568_s3 + $0x50] sm:$0xff] }
 0x149   :  { %v580_v16 = vld [vmem:[%s1568_s3 + $0xd0] sm:$0xff]  ;;  %v603_v25 = vadd.f32 %v1119_v22, %v564_v23  ;;  %531 = vst.msk [vmem:[%s1568_s3 + $0x60] sm:$0xff] %vm18_vm0, %v498_v18  ;;  %547 = vst.msk [vmem:[%s1568_s3 + $0xe0] sm:$0xff] %vm18_vm0, %v514_v19 }
 0x14a   :  { %v619_v26 = vadd.f32 %v1119_v22, %v580_v16  ;;  %v392_v27 = vpop.f32.mrb[26].mxu0  ;;  %v472_v28 = vpop.f32.mrb[26].mxu1 }
 0x14b   :  { %635 = vst.msk [vmem:[%s1568_s3 + $0x50] sm:$0xff] %vm18_vm0, %v603_v25  ;;  %v499_v29 = vadd.f32 %v392_v27, %v242_v13  ;;  %v515_v30 = vadd.f32 %v472_v28, %v258_v24  ;;  %v394_v31 = vpop.f32.mrb[27].mxu0  ;;  %v474_v32 = vpop.f32.mrb[27].mxu1 }
 0x14c   :  { %651 = vst.msk [vmem:[%s1568_s3 + $0xd0] sm:$0xff] %vm18_vm0, %v619_v26  ;;  %v565_v34 = vld [vmem:[%s1568_s3 + $0x58] sm:$0xff] }
 0x14d   :  { %v581_v35 = vld [vmem:[%s1568_s3 + $0xd8] sm:$0xff]  ;;  %v604_v37 = vadd.f32 %v1119_v22, %v565_v34  ;;  %532 = vst.msk [vmem:[%s1568_s3 + $0x68] sm:$0xff] %vm18_vm0, %v499_v29  ;;  %548 = vst.msk [vmem:[%s1568_s3 + $0xe8] sm:$0xff] %vm18_vm0, %v515_v30 }
 0x14e   :  { %v620_v38 = vadd.f32 %v1119_v22, %v581_v35  ;;  %v397_v39 = vpop.f32.mrb[28].mxu0  ;;  %v477_v40 = vpop.f32.mrb[28].mxu1 }
 0x14f   :  { %636 = vst.msk [vmem:[%s1568_s3 + $0x58] sm:$0xff] %vm18_vm0, %v604_v37  ;;  %v500_v41 = vadd.f32 %v397_v39, %v243_v33  ;;  %v516_v42 = vadd.f32 %v477_v40, %v259_v36  ;;  %v399_v43 = vpop.f32.mrb[29].mxu0  ;;  %v479_v44 = vpop.f32.mrb[29].mxu1 }
 0x150   :  { %652 = vst.msk [vmem:[%s1568_s3 + $0xd8] sm:$0xff] %vm18_vm0, %v620_v38  ;;  %v566_v46 = vld [vmem:[%s1568_s3 + $0x60] sm:$0xff] }
 0x151   :  { %v582_v47 = vld [vmem:[%s1568_s3 + $0xe0] sm:$0xff]  ;;  %v605_v49 = vadd.f32 %v1119_v22, %v566_v46  ;;  %533 = vst.msk [vmem:[%s1568_s3 + $0x70] sm:$0xff] %vm18_vm0, %v500_v41  ;;  %549 = vst.msk [vmem:[%s1568_s3 + $0xf0] sm:$0xff] %vm18_vm0, %v516_v42 }
 0x152   :  { %v621_v50 = vadd.f32 %v1119_v22, %v582_v47  ;;  %v402_v51 = vpop.f32.mrb[30].mxu0  ;;  %v482_v52 = vpop.f32.mrb[30].mxu1 }
 0x153   :  { %637 = vst.msk [vmem:[%s1568_s3 + $0x60] sm:$0xff] %vm18_vm0, %v605_v49  ;;  %v501_v53 = vadd.f32 %v402_v51, %v244_v45  ;;  %v517_v54 = vadd.f32 %v482_v52, %v260_v48  ;;  %v404_v55 = vpop.f32.mrb[31].mxu0  ;;  %v484_v56 = vpop.f32.mrb[31].mxu1 }
 0x154   :  { %653 = vst.msk [vmem:[%s1568_s3 + $0xe0] sm:$0xff] %vm18_vm0, %v621_v50  ;;  %v567_v57 = vld [vmem:[%s1568_s3 + $0x68] sm:$0xff] }
 0x155   :  { %v583_v58 = vld [vmem:[%s1568_s3 + $0xe8] sm:$0xff]  ;;  %v606_v59 = vadd.f32 %v1119_v22, %v567_v57  ;;  %534 = vst.msk [vmem:[%s1568_s3 + $0x78] sm:$0xff] %vm18_vm0, %v501_v53  ;;  %550 = vst.msk [vmem:[%s1568_s3 + $0xf8] sm:$0xff] %vm18_vm0, %v517_v54 }
 0x156   :  { %v622_v60 = vadd.f32 %v1119_v22, %v583_v58 }
 0x157   :  { %638 = vst.msk [vmem:[%s1568_s3 + $0x68] sm:$0xff] %vm18_vm0, %v606_v59 }
 0x158   :  { %654 = vst.msk [vmem:[%s1568_s3 + $0xe8] sm:$0xff] %vm18_vm0, %v622_v60  ;;  %v568_v61 = vld [vmem:[%s1568_s3 + $0x70] sm:$0xff] }
 0x159   :  { %v584_v62 = vld [vmem:[%s1568_s3 + $0xf0] sm:$0xff]  ;;  %v607_v63 = vadd.f32 %v1119_v22, %v568_v61 }
 0x15a   :  { %v623_v1 = vadd.f32 %v1119_v22, %v584_v62 }
 0x15b   :  { %639 = vst.msk [vmem:[%s1568_s3 + $0x70] sm:$0xff] %vm18_vm0, %v607_v63 }
 0x15c   :  { %655 = vst.msk [vmem:[%s1568_s3 + $0xf0] sm:$0xff] %vm18_vm0, %v623_v1  ;;  %v569_v2 = vld [vmem:[%s1568_s3 + $0x78] sm:$0xff] }
 0x15d   :  { %v585_v3 = vld [vmem:[%s1568_s3 + $0xf8] sm:$0xff]  ;;  %v608_v4 = vadd.f32 %v1119_v22, %v569_v2 }
 0x15e   :  { %v624_v5 = vadd.f32 %v1119_v22, %v585_v3 }
 0x15f   :  { %640 = vst.msk [vmem:[%s1568_s3 + $0x78] sm:$0xff] %vm18_vm0, %v608_v4 }
 0x160   :  { %656 = vst.msk [vmem:[%s1568_s3 + $0xf8] sm:$0xff] %vm18_vm0, %v624_v5 }

</bundles_post_ra>
